<compile_context>
chip_gen: v7x
topology: tpu7x:2x2x1
jax: 0.10.0
libtpu: 0.0.40
codegen_flags: <defaults>
</compile_context>

<pallas_src>
import functools

import jax
import jax.numpy as jnp
from jax import lax
from jax.experimental import pallas as pl
from jax.experimental.pallas import tpu as pltpu


def _temporal_block_kernel(x_ref, tidx_ref, w1s_ref, w2s_ref, b2_ref, o_ref,
                           *, k, dilation, c_out, slope):
    """One grid step = one batch element (lanes = time, L lane-dense).

    x_ref   : (C_in+1, L)            input with appended constant-1 row (bias fold)
    tidx_ref: (1, L) int32           time index 0..L-1 (causal mask for rolls)
    w1s_ref : ((k+1)*C_out, C_in+1)  rows [j*C_out:(j+1)*C_out] = conv1 tap-j weight,
                                     b1 folded into last column of the s=0 tap;
                                     rows [k*C_out:] = [Wd | bd] (1x1 downsample)
    w2s_ref : (k*C_out, C_out)       conv2 tap-j weight rows
    b2_ref  : (C_out, 1) f32         conv2 bias
    o_ref   : (C_out, L) f32         output block (written in final layout)
    """
    def leaky(v):                                    # nn.LeakyReLU(0.01)
        return jnp.where(v > 0, v, slope * v)

    tidx = tidx_ref[...]                             # (1, L) int32

    def causal_sum(y, base_bias=None):
        # y: (k*C_out, L) f32, tap j at rows [j*C_out:(j+1)*C_out] (sublane-aligned,
        # C_out=8).  Shift each tap by s_j=(k-1-j)*dilation via XLU roll, mask the
        # wrapped lanes (t < s_j) to zero, and sum in f32.
        acc = y[(k - 1) * c_out:k * c_out, :]        # s=0 tap: no roll, no mask
        if base_bias is not None:
            acc = acc + base_bias
        for j in range(k - 1):
            s = (k - 1 - j) * dilation               # static per-tap shift
            rolled = pltpu.roll(y[j * c_out:(j + 1) * c_out, :], shift=s, axis=1)
            acc = acc + jnp.where(tidx >= s, rolled, 0.0)
        return acc

    # ---- conv1 (causal dilated, chomped) + residual 1x1: one stacked MXU dot ----
    y1 = jnp.dot(w1s_ref[...], x_ref[...], preferred_element_type=jnp.float32)
    h1 = leaky(causal_sum(y1[:k * c_out, :]))        # (C_out, L) f32, b1 folded in
    res = y1[k * c_out:, :]                          # (C_out, L) f32, bd folded in
    # TODO(synk): dropout1 / dropout2 omitted (eval-mode identity).

    # ---- conv2 (commuted): single dot on bf16 h1, rolls/masks on its output ----
    y2 = jnp.dot(w2s_ref[...], h1.astype(w2s_ref.dtype),
                 preferred_element_type=jnp.float32)
    h2 = leaky(causal_sum(y2, base_bias=b2_ref[...]))

    o_ref[...] = leaky(h2 + res)


def temporal_block(x, params, *, kernel_size, dilation, padding, slope=0.01,
                   mxu_dtype=jnp.bfloat16):
    """x: (B, C_in, L) float32.  Returns (B, C_out, L) float32."""
    B, C_in, L = x.shape
    w1, b1, w2, b2, wd, bd = params
    C_out = w1.shape[0]
    k = kernel_size
    assert padding == (k - 1) * dilation, "standard causal TCN padding expected"
    assert L % 128 == 0, "lane-dense layout requires L to be a multiple of 128"
    assert (k - 1) * dilation < L, "causal shift must stay within one sequence"
    assert C_out % 8 == 0, "tap row-blocks must be sublane (8) aligned"

    # Input with a constant-1 row appended (folds b1 / bd into the stacked dot).
    x_aug = jnp.concatenate([x, jnp.ones((B, 1, L), x.dtype)], axis=1)
    x_aug = x_aug.astype(mxu_dtype)                  # (B, C_in+1, L)

    # Stacked conv1 + downsample weight.  Bias column: b1 only on the s=0 tap
    # (j = k-1, the un-rolled/un-masked one); bd on the residual rows.
    b1c = b1.reshape(C_out, 1).astype(jnp.float32)
    bdc = bd.reshape(C_out, 1).astype(jnp.float32)
    zero = jnp.zeros((C_out, 1), jnp.float32)
    tap_rows = [jnp.concatenate([w1[:, :, j], b1c if j == k - 1 else zero], axis=1)
                for j in range(k)]
    res_rows = jnp.concatenate([wd, bdc], axis=1)
    w1s = jnp.concatenate(tap_rows + [res_rows], axis=0).astype(mxu_dtype)
    # w1s: ((k+1)*C_out, C_in+1)

    # Stacked conv2 weight, tap-major along rows: (k*C_out, C_out)
    w2s = jnp.concatenate([w2[:, :, j] for j in range(k)], axis=0).astype(mxu_dtype)

    tidx = jnp.arange(L, dtype=jnp.int32).reshape(1, L)
    b2c = b2.reshape(C_out, 1).astype(jnp.float32)

    kern = functools.partial(_temporal_block_kernel, k=k, dilation=dilation,
                             c_out=C_out, slope=slope)

    out = pl.pallas_call(
        kern,
        out_shape=jax.ShapeDtypeStruct((B, C_out, L), jnp.float32),
        grid=(B,),
        in_specs=[
            pl.BlockSpec((None, C_in + 1, L), lambda b: (b, 0, 0)),      # x_aug
            pl.BlockSpec((1, L), lambda b: (0, 0)),                      # tidx
            pl.BlockSpec(((k + 1) * C_out, C_in + 1), lambda b: (0, 0)),  # w1s
            pl.BlockSpec((k * C_out, C_out), lambda b: (0, 0)),          # w2s
            pl.BlockSpec((C_out, 1), lambda b: (0, 0)),                  # b2
        ],
        out_specs=pl.BlockSpec((None, C_out, L), lambda b: (b, 0, 0)),
        compiler_params=pltpu.CompilerParams(
            dimension_semantics=("parallel",)),      # v7x: batch across 2 TCs
    )(x_aug, tidx, w1s, w2s, b2c)

    return out                                       # already (B, C_out, L)


def ref_forward(x, params, *, kernel_size, dilation, padding, slope=0.01):
    """Plain-JAX f32 reference mirroring torch conv(pad both)+Chomp1d semantics."""
    w1, b1, w2, b2, wd, bd = params
    leaky = lambda v: jnp.where(v > 0, v, slope * v)

    def conv(inp, w, b):
        y = lax.conv_general_dilated(
            inp, w, window_strides=(1,),
            padding=[(padding, padding)], rhs_dilation=(dilation,),
            dimension_numbers=('NCH', 'OIH', 'NCH'))
        if padding > 0:
            y = y[:, :, :-padding]                   # Chomp1d
        return y + b[None]

    h1 = leaky(conv(x, w1, b1))
    h2 = leaky(conv(h1, w2, b2))
    res = jnp.einsum('oc,bcl->bol', wd, x) + bd[None]  # 1x1 downsample
    return leaky(h2 + res)


def make_params(key, n_inputs, n_outputs, kernel_size):
    """Deterministic parameter init; weight_norm folded into effective weights."""
    ks = jax.random.split(key, 8)

    def weight_normed(kv, kg, shape):
        v = 0.01 * jax.random.normal(kv, shape, jnp.float32)
        g = 1.0 + 0.1 * jax.random.normal(kg, (shape[0], 1, 1), jnp.float32)
        norm = jnp.sqrt(jnp.sum(v * v, axis=(1, 2), keepdims=True)) + 1e-12
        return (g * v / norm).astype(jnp.float32)

    w1 = weight_normed(ks[0], ks[1], (n_outputs, n_inputs, kernel_size))
    w2 = weight_normed(ks[2], ks[3], (n_outputs, n_outputs, kernel_size))
    b1 = 0.05 * jax.random.normal(ks[4], (n_outputs, 1), jnp.float32)
    b2 = 0.05 * jax.random.normal(ks[5], (n_outputs, 1), jnp.float32)
    wd = 0.01 * jax.random.normal(ks[6], (n_outputs, n_inputs), jnp.float32)
    bd = 0.05 * jax.random.normal(ks[7], (n_outputs, 1), jnp.float32)
    return (w1, b1, w2, b2, wd, bd)


if __name__ == "__main__":
    # TemporalBlock(n_inputs=4, n_outputs=8, kernel_size=3, stride=1,
    #               dilation=2, padding=(3-1)*2=4, dropout=0.2)
    B, C_in, C_out, L = 2, 4, 8, 128
    kernel_size, stride, dilation = 3, 1, 2
    padding = (kernel_size - 1) * dilation

    key = jax.random.PRNGKey(0)
    kx, kp = jax.random.split(key)
    x = jax.random.normal(kx, (B, C_in, L), jnp.float32)
    params = make_params(kp, C_in, C_out, kernel_size)

    fwd_bf16 = jax.jit(lambda xx, pp: temporal_block(
        xx, pp, kernel_size=kernel_size, dilation=dilation, padding=padding))
    fwd_f32 = jax.jit(lambda xx, pp: temporal_block(
        xx, pp, kernel_size=kernel_size, dilation=dilation, padding=padding,
        mxu_dtype=jnp.float32))

    out_bf16 = jax.block_until_ready(fwd_bf16(x, params))
    out_f32 = jax.block_until_ready(fwd_f32(x, params))

    ref = ref_forward(x, params, kernel_size=kernel_size,
                      dilation=dilation, padding=padding)

    assert out_f32.shape == (B, C_out, L)
    # Tight structural check with f32 MXU operands.
    err_f32 = float(jnp.max(jnp.abs(out_f32 - ref)))
    assert jnp.allclose(out_f32, ref, atol=1e-4, rtol=1e-4), err_f32
    # Production (bf16 MXU operand) path: looser tolerance from bf16 rounding
    # (residual/skip dot is also bf16 here; keep it f32 if tighter accuracy matters).
    err_bf16 = float(jnp.max(jnp.abs(out_bf16 - ref)))
    assert jnp.allclose(out_bf16, ref, atol=5e-2, rtol=5e-2), err_bf16

    print("KERNEL_OK")
</pallas_src>

<mosaic_0001>
module attributes {stable_mosaic.version = 11 : i64} {
  func.func @_temporal_block_kernel(%arg0: i32, %arg1: memref<1x5x128xbf16, #tpu.memory_space<vmem>>, %arg2: memref<1x128xi32, #tpu.memory_space<vmem>>, %arg3: memref<32x5xbf16, #tpu.memory_space<vmem>>, %arg4: memref<24x8xbf16, #tpu.memory_space<vmem>>, %arg5: memref<8x1xf32, #tpu.memory_space<vmem>>, %arg6: memref<1x8x128xf32, #tpu.memory_space<vmem>>) attributes {dimension_semantics = [#tpu.dimension_semantics<parallel>], iteration_bounds = array<i64: 2>, scalar_prefetch = 0 : i64, scratch_operands = 0 : i64, tpu.core_type = #tpu.core_type<tc>, window_params = [{transform_indices = @transform_0, window_bounds = array<i64: 1, 5, 128>}, {pipeline_mode = #tpu.pipeline_mode<synchronous>, transform_indices = @transform_1, window_bounds = array<i64: 1, 128>}, {pipeline_mode = #tpu.pipeline_mode<synchronous>, transform_indices = @transform_2, window_bounds = array<i64: 32, 5>}, {pipeline_mode = #tpu.pipeline_mode<synchronous>, transform_indices = @transform_3, window_bounds = array<i64: 24, 8>}, {pipeline_mode = #tpu.pipeline_mode<synchronous>, transform_indices = @transform_4, window_bounds = array<i64: 8, 1>}, {transform_indices = @transform_5, window_bounds = array<i64: 1, 8, 128>}]} {
    %c0 = arith.constant 0 : index
    %c0_0 = arith.constant 0 : index
    %0 = vector.load %arg2[%c0, %c0_0] : memref<1x128xi32, #tpu.memory_space<vmem>>, vector<1x128xi32>
    %c0_1 = arith.constant 0 : index
    %c0_2 = arith.constant 0 : index
    %1 = vector.load %arg3[%c0_1, %c0_2] : memref<32x5xbf16, #tpu.memory_space<vmem>>, vector<32x5xbf16>
    %c0_3 = arith.constant 0 : index
    %c0_4 = arith.constant 0 : index
    %c0_5 = arith.constant 0 : index
    %2 = vector.load %arg1[%c0_3, %c0_4, %c0_5] : memref<1x5x128xbf16, #tpu.memory_space<vmem>>, vector<1x5x128xbf16>
    %3 = vector.shape_cast %2 : vector<1x5x128xbf16> to vector<5x128xbf16>
    %cst = arith.constant dense<0.000000e+00> : vector<32x128xf32>
    %4 = tpu.matmul %1, %3, %cst {dimension_numbers = #tpu.dot_dimension_numbers<[1], [0], [0], [1], [0, 0, 1, 1], [], []>} : vector<32x5xbf16>, vector<5x128xbf16>, vector<32x128xf32> -> vector<32x128xf32>
    %5 = vector.extract_strided_slice %4 {offsets = [0, 0], sizes = [24, 128], strides = [1, 1]} : vector<32x128xf32> to vector<24x128xf32>
    %6 = vector.extract_strided_slice %5 {offsets = [16, 0], sizes = [8, 128], strides = [1, 1]} : vector<24x128xf32> to vector<8x128xf32>
    %7 = vector.extract_strided_slice %5 {offsets = [0, 0], sizes = [8, 128], strides = [1, 1]} : vector<24x128xf32> to vector<8x128xf32>
    %c4_i32 = arith.constant 4 : i32
    %8 = tpu.dynamic_rotate %7 by %c4_i32 dim 1 : vector<8x128xf32>, i32 -> vector<8x128xf32>
    %c4_i32_6 = arith.constant 4 : i32
    %9 = vector.broadcast %c4_i32_6 : i32 to vector<1x128xi32>
    %10 = arith.cmpi sge, %0, %9 : vector<1x128xi32>
    %cst_7 = arith.constant 0.000000e+00 : f32
    %11 = vector.shape_cast %10 : vector<1x128xi1> to vector<1x128xi1>
    %12 = vector.broadcast %11 : vector<1x128xi1> to vector<8x128xi1>
    %13 = vector.broadcast %cst_7 : f32 to vector<8x128xf32>
    %14 = arith.select %12, %8, %13 : vector<8x128xi1>, vector<8x128xf32>
    %15 = arith.addf %6, %14 : vector<8x128xf32>
    %16 = vector.extract_strided_slice %5 {offsets = [8, 0], sizes = [8, 128], strides = [1, 1]} : vector<24x128xf32> to vector<8x128xf32>
    %c2_i32 = arith.constant 2 : i32
    %17 = tpu.dynamic_rotate %16 by %c2_i32 dim 1 : vector<8x128xf32>, i32 -> vector<8x128xf32>
    %c2_i32_8 = arith.constant 2 : i32
    %18 = vector.broadcast %c2_i32_8 : i32 to vector<1x128xi32>
    %19 = arith.cmpi sge, %0, %18 : vector<1x128xi32>
    %cst_9 = arith.constant 0.000000e+00 : f32
    %20 = vector.shape_cast %19 : vector<1x128xi1> to vector<1x128xi1>
    %21 = vector.broadcast %20 : vector<1x128xi1> to vector<8x128xi1>
    %22 = vector.broadcast %cst_9 : f32 to vector<8x128xf32>
    %23 = arith.select %21, %17, %22 : vector<8x128xi1>, vector<8x128xf32>
    %24 = arith.addf %15, %23 : vector<8x128xf32>
    %cst_10 = arith.constant 0.000000e+00 : f32
    %25 = vector.broadcast %cst_10 : f32 to vector<8x128xf32>
    %26 = arith.cmpf ogt, %24, %25 : vector<8x128xf32>
    %cst_11 = arith.constant 0.00999999977 : f32
    %27 = vector.broadcast %cst_11 : f32 to vector<8x128xf32>
    %28 = arith.mulf %27, %24 : vector<8x128xf32>
    %29 = arith.select %26, %24, %28 : vector<8x128xi1>, vector<8x128xf32>
    %30 = vector.extract_strided_slice %4 {offsets = [24, 0], sizes = [8, 128], strides = [1, 1]} : vector<32x128xf32> to vector<8x128xf32>
    %c0_12 = arith.constant 0 : index
    %c0_13 = arith.constant 0 : index
    %31 = vector.load %arg4[%c0_12, %c0_13] : memref<24x8xbf16, #tpu.memory_space<vmem>>, vector<24x8xbf16>
    %32 = arith.truncf %29 : vector<8x128xf32> to vector<8x128xbf16>
    %cst_14 = arith.constant dense<0.000000e+00> : vector<24x128xf32>
    %33 = tpu.matmul %31, %32, %cst_14 {dimension_numbers = #tpu.dot_dimension_numbers<[1], [0], [0], [1], [0, 0, 1, 1], [], []>} : vector<24x8xbf16>, vector<8x128xbf16>, vector<24x128xf32> -> vector<24x128xf32>
    %c0_15 = arith.constant 0 : index
    %c0_16 = arith.constant 0 : index
    %34 = vector.load %arg5[%c0_15, %c0_16] : memref<8x1xf32, #tpu.memory_space<vmem>>, vector<8x1xf32>
    %35 = vector.extract_strided_slice %33 {offsets = [16, 0], sizes = [8, 128], strides = [1, 1]} : vector<24x128xf32> to vector<8x128xf32>
    %36 = vector.broadcast %34 : vector<8x1xf32> to vector<8x128xf32>
    %37 = arith.addf %35, %36 : vector<8x128xf32>
    %38 = vector.extract_strided_slice %33 {offsets = [0, 0], sizes = [8, 128], strides = [1, 1]} : vector<24x128xf32> to vector<8x128xf32>
    %c4_i32_17 = arith.constant 4 : i32
    %39 = tpu.dynamic_rotate %38 by %c4_i32_17 dim 1 : vector<8x128xf32>, i32 -> vector<8x128xf32>
    %c4_i32_18 = arith.constant 4 : i32
    %40 = vector.broadcast %c4_i32_18 : i32 to vector<1x128xi32>
    %41 = arith.cmpi sge, %0, %40 : vector<1x128xi32>
    %cst_19 = arith.constant 0.000000e+00 : f32
    %42 = vector.shape_cast %41 : vector<1x128xi1> to vector<1x128xi1>
    %43 = vector.broadcast %42 : vector<1x128xi1> to vector<8x128xi1>
    %44 = vector.broadcast %cst_19 : f32 to vector<8x128xf32>
    %45 = arith.select %43, %39, %44 : vector<8x128xi1>, vector<8x128xf32>
    %46 = arith.addf %37, %45 : vector<8x128xf32>
    %47 = vector.extract_strided_slice %33 {offsets = [8, 0], sizes = [8, 128], strides = [1, 1]} : vector<24x128xf32> to vector<8x128xf32>
    %c2_i32_20 = arith.constant 2 : i32
    %48 = tpu.dynamic_rotate %47 by %c2_i32_20 dim 1 : vector<8x128xf32>, i32 -> vector<8x128xf32>
    %c2_i32_21 = arith.constant 2 : i32
    %49 = vector.broadcast %c2_i32_21 : i32 to vector<1x128xi32>
    %50 = arith.cmpi sge, %0, %49 : vector<1x128xi32>
    %cst_22 = arith.constant 0.000000e+00 : f32
    %51 = vector.shape_cast %50 : vector<1x128xi1> to vector<1x128xi1>
    %52 = vector.broadcast %51 : vector<1x128xi1> to vector<8x128xi1>
    %53 = vector.broadcast %cst_22 : f32 to vector<8x128xf32>
    %54 = arith.select %52, %48, %53 : vector<8x128xi1>, vector<8x128xf32>
    %55 = arith.addf %46, %54 : vector<8x128xf32>
    %cst_23 = arith.constant 0.000000e+00 : f32
    %56 = vector.broadcast %cst_23 : f32 to vector<8x128xf32>
    %57 = arith.cmpf ogt, %55, %56 : vector<8x128xf32>
    %cst_24 = arith.constant 0.00999999977 : f32
    %58 = vector.broadcast %cst_24 : f32 to vector<8x128xf32>
    %59 = arith.mulf %58, %55 : vector<8x128xf32>
    %60 = arith.select %57, %55, %59 : vector<8x128xi1>, vector<8x128xf32>
    %61 = arith.addf %60, %30 : vector<8x128xf32>
    %cst_25 = arith.constant 0.000000e+00 : f32
    %62 = vector.broadcast %cst_25 : f32 to vector<8x128xf32>
    %63 = arith.cmpf ogt, %61, %62 : vector<8x128xf32>
    %cst_26 = arith.constant 0.00999999977 : f32
    %64 = vector.broadcast %cst_26 : f32 to vector<8x128xf32>
    %65 = arith.mulf %64, %61 : vector<8x128xf32>
    %66 = arith.select %63, %61, %65 : vector<8x128xi1>, vector<8x128xf32>
    %c0_27 = arith.constant 0 : index
    %c0_28 = arith.constant 0 : index
    %c0_29 = arith.constant 0 : index
    %67 = vector.load %arg6[%c0_27, %c0_28, %c0_29] : memref<1x8x128xf32, #tpu.memory_space<vmem>>, vector<1x8x128xf32>
    %68 = vector.shape_cast %67 : vector<1x8x128xf32> to vector<8x128xf32>
    %69 = vector.shape_cast %66 : vector<8x128xf32> to vector<1x8x128xf32>
    tpu.vector_store %arg6[%c0_27, %c0_28, %c0_29], %69 {strides = array<i32>} : memref<1x8x128xf32, #tpu.memory_space<vmem>>, vector<1x8x128xf32>,
    return
  }
  func.func @transform_0(%arg0: i32) -> (i32, i32, i32) {
    %c0_i32 = arith.constant 0 : i32
    %c0_i32_0 = arith.constant 0 : i32
    %c0_i32_1 = arith.constant 0 : i32
    return %arg0, %c0_i32, %c0_i32_0 : i32, i32, i32
  }
  func.func @transform_1(%arg0: i32) -> (i32, i32) {
    %c0_i32 = arith.constant 0 : i32
    %c0_i32_0 = arith.constant 0 : i32
    %c0_i32_1 = arith.constant 0 : i32
    return %c0_i32, %c0_i32_0 : i32, i32
  }
  func.func @transform_2(%arg0: i32) -> (i32, i32) {
    %c0_i32 = arith.constant 0 : i32
    %c0_i32_0 = arith.constant 0 : i32
    %c0_i32_1 = arith.constant 0 : i32
    return %c0_i32, %c0_i32_0 : i32, i32
  }
  func.func @transform_3(%arg0: i32) -> (i32, i32) {
    %c0_i32 = arith.constant 0 : i32
    %c0_i32_0 = arith.constant 0 : i32
    %c0_i32_1 = arith.constant 0 : i32
    return %c0_i32, %c0_i32_0 : i32, i32
  }
  func.func @transform_4(%arg0: i32) -> (i32, i32) {
    %c0_i32 = arith.constant 0 : i32
    %c0_i32_0 = arith.constant 0 : i32
    %c0_i32_1 = arith.constant 0 : i32
    return %c0_i32, %c0_i32_0 : i32, i32
  }
  func.func @transform_5(%arg0: i32) -> (i32, i32, i32) {
    %c0_i32 = arith.constant 0 : i32
    %c0_i32_0 = arith.constant 0 : i32
    %c0_i32_1 = arith.constant 0 : i32
    return %arg0, %c0_i32, %c0_i32_0 : i32, i32, i32
  }
}

</mosaic_0001>

<bundles_post_ra>
// kernel: _lambda_.1
= control target key start
LH: loop header
LB: loop body
LE: loop exit
PB: predicated region body
PF: predicated region fallthrough
CT: control target
= control target key end

     0   :  { %10 = vsyncpa [#allocation3], 0  ;;  %s805_s0 = inlined_call_operand.vmem [shape: bf16[2,5,128], index: 0, kind: input, shape index: {}]   ;;  %s806_s1 = inlined_call_operand.vmem [shape: s32[1,128], index: 1, kind: input, shape index: {}]   ;;  %s807_s2 = inlined_call_operand.vmem [shape: bf16[32,5], index: 2, kind: input, shape index: {}]   ;;  %s808_s3 = inlined_call_operand.vmem [shape: bf16[24,8], index: 3, kind: input, shape index: {}]   ;;  %s809_s4 = inlined_call_operand.vmem [shape: f32[8,1], index: 4, kind: input, shape index: {}]   ;;  %s810_s5 = inlined_call_operand.hbm [shape: f32[2,8,128], index: 5, kind: output, shape index: {}]  }
   0x1   :  { %12 = vsyncpa [#allocation3 + $0x1], 0  ;;  %s677_s18 = smov 0   ;;  %s679_s19 = smov 0  }
   0x2   :  { %s681_s20 = smov 0   ;;  %s683_s21 = smov 0  }
   0x3 LB: > { %s698_s22 = sadd.s32 4294967295, %s640_s21   ;;  %s492_s23 = sadd.s32 4294967294, %s640_s21   ;;  %s640_s21 = sphi %s683_s21, %s816_s21   ;;  %s636_s20 = sphi %s681_s20, %s815_s20   ;;  %s632_s19 = sphi %s679_s19, %s814_s19   ;;  %s628_s18 = sphi %s677_s18, %s813_s18  }
   0x4   : > { %s702_s24 = sadd.s32 1, %s640_s21   ;;  %s135_s25 = sadd.s32 1, %s636_s20 }
   0x5   : > { %s132_s26 = ssub.s32 %s640_s21, %s702_s24  ;;  %p145_p0 = scmp.ne.s32.totalorder %s636_s20, %s632_s19 }
   0x6   : > { %p133_p1 = scmp.eq.s32.totalorder %s132_s26, 0  ;;  %p146_p2 = scmp.eq.s32.totalorder %s698_s22, 1 }
   0x7   : > { %p151_p3 = scmp.ne.s32.totalorder %s632_s19, %s628_s18  ;;  %p152_p4 = scmp.eq.s32.totalorder %s492_s23, 1 }
   0x8   : > { %s713_s27 = scalar_select %p133_p1, %s636_s20, %s135_s25  }
   0x9   : > { %p715_p5 = por %p146_p2, %p145_p0  ;;  %p719_p6 = por %p152_p4, %p151_p3 }
   0xa   : > { %p495_p7 = scmp.ge.s32.totalorder %s640_s21, 1  ;;  %p189_p8 = scmp.lt.s32.totalorder %s640_s21, 3 }
   0xc   : > { %p190_p9 = pnand %p495_p7, %p189_p8 }
   0xd   : > { %p216_p10 = scmp.lt.s32.totalorder (!%p190_p9), %s698_s22, 1  ;;  %vm244_vm0 = vcmask (!%p190_p9), 1041408   ;;  %vm245_vm1 = vcmask (!%p190_p9), 1042432   ;;  %v642_v0 = vmov (!%p190_p9), 65535   ;;  %v574_v2 = vld [vmem:[%s807_s2] sm:$0xff] (!%p190_p9)   ;;  %vm237_vm2 = vcmask (!%p190_p9), 39936  }
   0xe   : > { %193 = sbr.rel (%p190_p9) target bundleno = 731 (0x2db), region = 40  ;;  %v246_v1 = vsel (!%p190_p9), %vm244_vm0, 4294967295, %v642_v0  ;;  %518 = vmatprep.mubr.msk.bf16.mxu0 (!%p190_p9), %vm237_vm2, %v574_v2  ;;  %v575_v6 = vld [vmem:[%s807_s2 + $0x8] sm:$0xff] (!%p190_p9)   ;;  %v643_v7 = vmov (!%p190_p9), 0   ;;  %s644_s14 = smov (!%p190_p9), 4   ;;  %v576_v11 = vld [vmem:[%s808_s3] sm:$0xff] (!%p190_p9)   ;;  %v304_v14 = vlaneseq (!%p190_p9) }
   0xf   : > { %v247_v3 = vsel (!%p190_p9), %vm245_vm1, %v246_v1, 0  ;;  %572 = vset.pattern.permute.xlu1 (!%p190_p9), %v643_v7  ;;  %573 = vset.pattern.permute.xlu0 (!%p190_p9), %v643_v7  ;;  %vm337_vm3 = vcmask (!%p190_p9), 64512   ;;  %v396_v13 = vld [vmem:[%s809_s4] sm:$0xff] (!%p190_p9)  ;;  %s645_s25 = smov (!%p190_p9), 2   ;;  %vm344_vm9 = vcmask (!%p190_p9), 1043456   ;;  %s507_s10 = sshll.u32 (!%p190_p9), %s698_s22, 7 }
  0x10   : > { %524 = vmatprep.mubr.msk.bf16.mxu1 (!%p190_p9), %vm337_vm3, %v576_v11  ;;  %399 = vperm.xlu1 (!%p190_p9), %572, %v396_v13   ;;  %v221_v15 = vld [vmem:[%s806_s1] sm:$0x1] (!%p190_p9)  ;;  %v305_v16 = vshrl.u32 (!%p190_p9), %v304_v14, 7  ;;  %v577_v32 = vld [vmem:[%s808_s3 + $0x8] ss:$0 sps:$4 sm:$0xff] (!%p190_p9)   ;;  %s763_s15 = scalar_lea.hbm (!%p190_p9), %s810_s5, %s507_s10 }
  0x11   : > { %vm302_vm4 = vcmp.ge.s32.totalorder (!%p190_p9), %v221_v15, 4  ;;  %vm313_vm5 = vcmp.ge.s32.totalorder (!%p190_p9), %v221_v15, 2 }
  0x12   : > { %v306_v17 = vsub.s32 (!%p190_p9), 0, %v305_v16  ;;  %v303_v18 = vsel (!%p190_p9), %vm302_vm4, 1, %v643_v7  ;;  %v314_v20 = vsel (!%p190_p9), %vm313_vm5, 1, %v643_v7 }
  0x14   : > { %v307_v19 = vrot.slane (!%p190_p9), %v303_v18, %v306_v17  ;;  %v318_v21 = vrot.slane (!%p190_p9), %v314_v20, %v306_v17 }
  0x15   : > { %s217_s7 = scalar_select %p216_p10, %s698_s22, 1 }
  0x16   : > { %vm308_vm6 = vcmp.eq.s32.totalorder %v307_v19, 1  ;;  %vm319_vm7 = vcmp.eq.s32.totalorder %v318_v21, 1  ;;  %s646_s22 = smov [#allocation2]  }
  0x17   : > { %s497_s8 = sshll.u32 %s217_s7, 2  ;;  %s582_s23 = sshll.u32 %s646_s22, 4  ;;  %s583_s23 = int_to_ptr.vmem [resolvable:$false] %s582_s23 }
  0x18   : > { %s219_s11 = scalar_lea.vmem %s805_s0, %s497_s8  ;;  %s213_s8 = sand.u32 1, %s632_s19  }
  0x19   : > { %v226_v4 = vld [vmem:[%s219_s11] sm:$0x7]  ;;  %s496_s9 = sshll.u32 %s213_s8, 3  ;;  %s420_s16 = scalar_lea.sflag [#allocation3], %s213_s8 }
  0x1a   : > { %v249_v5 = vand.u32 %v247_v3, %v226_v4  ;;  %s215_s11 = scalar_lea.vmem [#allocation2], %s496_s9 }
  0x1b   : > { %s433_s12 = sshll.u32 %s215_s11, 4  ;;  %s765_s12 = int_to_ptr.vmem [resolvable:$true] %s433_s12 }
  0x1c   : > { %516 = vmatprep.subr.bf16.mxu0 %v249_v5  ;;  %s578_s17 = scalar_lea.vmem %s765_s12, 128  ;;  %p585_p0 = scmp.lt.s32.totalorder %s765_s12, %s583_s23 }
  0x1d   : > { %517 = vmatpush3.bf16.msra.mxu0 %v249_v5  ;;  %p579_p11 = scmp.ne.s32.totalorder %s765_s12, %s578_s17 }
  0x1f   : > { %p580_p12 = pnand %p579_p11, %p715_p5 }
  0x20   : > { %519 = vmatmul.mubr.msk.bf16.vlgmr.msra.gmra.mrb[0].mxu0 %vm237_vm2, %v575_v6 }
  0x21   : > { %p581_p13 = pneg %p580_p12 }
  0x8f   : > { %v400_v37 = vpop.permute.xlu1 %399 }
  0xf3   : > { %v520_v8 = vpop.f32.mrb[0].mxu0 }
  0xf4   : > { %v285_v9 = vpop.f32.mrb[1].mxu0 }
  0xf5   : > { %300 = vrot.lane.b32.xlu0 %v285_v9, %s644_s14  ;;  %v521_v10 = vpop.f32.mrb[2].mxu0 }
  0xf6   : > { %v288_v12 = vpop.f32.mrb[3].mxu0 }
  0xf9   : > { %311 = vrot.lane.b32.xlu0 %v288_v12, %s645_s25 }
 0x167   : > { %v301_v22 = vpop.permute.xlu0 %300 }
 0x168   : > { %v309_v23 = vsel %vm308_vm6, %v301_v22, 0.0 }
 0x169   : > { %v310_v24 = vadd.f32 %v520_v8, %v309_v23 }
 0x16b   : > { %v312_v25 = vpop.permute.xlu0 %311 }
 0x16c   : > { %v320_v26 = vsel %vm319_vm7, %v312_v25, 0.0 }
 0x16d   : > { %v321_v27 = vadd.f32 %v320_v26, %v310_v24 }
 0x16f   : > { %v323_v28 = vmul.f32 0.01, %v321_v27  ;;  %vm322_vm8 = vcmp.gt.f32.partialorder %v321_v27, 0.0 }
 0x171   : > { %v324_v29 = vsel %vm322_vm8, %v321_v27, %v323_v28 }
 0x172   : > { %v328_v30 = vpack.c.bf16 %v324_v29, %v324_v29 }
 0x174   : > { %528 = vmatprep.subr.msk.bf16.mxu1 %vm344_vm9, %v328_v30  ;;  %v346_v31 = vsel %vm344_vm9, %v328_v30, 0 }
 0x175   : > { %523 = vmatpush3.bf16.msra.mxu1 %v346_v31 }
 0x178   : > { %525 = vmatmul.mubr.msk.bf16.vlgmr.msra.gmra.mrb[0].mxu1 %vm337_vm3, %v577_v32 }
 0x24b   : > { %v526_v33 = vpop.f32.mrb[0].mxu1 }
 0x24c   : > { %v382_v34 = vpop.f32.mrb[1].mxu1  ;;  %v402_v38 = vadd.f32 %v526_v33, %v400_v37 }
 0x24d   : > { %403 = vrot.lane.b32.xlu1 %v382_v34, %s644_s14  ;;  %v527_v35 = vpop.f32.mrb[2].mxu1 }
 0x24e   : > { %v385_v36 = vpop.f32.mrb[3].mxu1 }
 0x24f   : > { %407 = vrot.lane.b32.xlu0 %v385_v36, %s645_s25  ;;  %s584_s25 = scalar_lea.vmem %s583_s23, 256 }
 0x250   : > { %p586_p1 = scmp.lt.s32.totalorder %s584_s25, %s578_s17 }
 0x252   : > { %p587_p2 = por %p586_p1, %p585_p0 }
 0x254   : > { %p588_p3 = pnand %p587_p2, %p581_p13 }
 0x2bf   : > { %v404_v39 = vpop.permute.xlu1 %403 }
 0x2c0   : > { %v405_v40 = vsel %vm308_vm6, %v404_v39, 0.0 }
 0x2c1   : > { %v406_v41 = vadd.f32 %v405_v40, %v402_v38  ;;  %v408_v42 = vpop.permute.xlu0 %407 }
 0x2c2   : > { %v409_v43 = vsel %vm319_vm7, %v408_v42, 0.0 }
 0x2c3   : > { %v410_v44 = vadd.f32 %v409_v43, %v406_v41 }
 0x2c5   : > { %vm411_vm10 = vcmp.gt.f32.partialorder %v410_v44, 0.0  ;;  %v412_v45 = vmul.f32 0.01, %v410_v44 }
 0x2c7   : > { %v413_v46 = vsel %vm411_vm10, %v410_v44, %v412_v45 }
 0x2c8   : > { %v414_v47 = vadd.f32 %v521_v10, %v413_v46 }
 0x2ca   : > { %vm415_vm11 = vcmp.gt.f32.partialorder %v414_v47, 0.0  ;;  %v416_v48 = vmul.f32 0.01, %v414_v47 }
 0x2cc   : > { %v417_v49 = vsel %vm415_vm11, %v414_v47, %v416_v48 }
 0x2cd   : > { %418 = vst [vmem:[%s215_s11] sm:$0xff] %v417_v49 }
 0x2ce   : > { %591 = shalt.err (!%p588_p3)
}
 0x2cf   : > { %s592_s26 = scalar_lea.hbm %s763_s15, 128  ;;  %s596_s7 = scalar_lea.hbm %s810_s5, 256 }
 0x2d0   : > { %p593_p4 = scmp.ne.s32.totalorder %s763_s15, %s592_s26  ;;  %p597_p9 = scmp.lt.u32.totalorder %s763_s15, %s810_s5 }
 0x2d1   : > { %p598_p10 = scmp.lt.u32.totalorder %s596_s7, %s592_s26  ;;  %p600_p12 = scmp.lt.u32.totalorder %s592_s26, %s763_s15 }
 0x2d2   : > { %p594_p7 = pnand %p593_p4, %p715_p5 }
 0x2d3   : > { %p599_p11 = por %p598_p10, %p597_p9 }
 0x2d4   : > { %p595_p8 = pneg %p594_p7 }
 0x2d5   : > { %p601_p13 = por %p600_p12, %p599_p11 }
 0x2d7   : > { %p602_p0 = pnand %p601_p13, %p595_p8 }
 0x2d9   : > { %605 = shalt.err (!%p602_p0)
}
 0x2da   : > { %529 = dma.vmem_to_hbm [thread:$0]  (%p715_p5), %s765_s12, 128, %s763_s15, %s420_s16  }
 0x2db PF: > { %p535_p1 = scmp.ge.s32.totalorder %s640_s21, 2  ;;  %s445_s10 = sand.u32 1, %s628_s18  }
 0x2dc   : > { %s446_s11 = scalar_lea.sflag [#allocation3], %s445_s10 }
 0x2dd   : > { %p532_p2 = pnand %p535_p1, %p719_p6 }
 0x2df   : > { %623 = dma.done.wait (!%p532_p2), %s446_s11, 128  }
 0x2e0   : > { %625 = vsyncadd (!%p532_p2), %s446_s11, 4294967168  ;;  %p15_p3 = scmp.ge.s32.totalorder %s702_s24, 4   ;;  %s813_s18 = smov %s632_s19 }
 0x2e1   : > { %s814_s19 = smov %s636_s20  ;;  %s815_s20 = smov %s713_s27 }
 0x2e2   : > { %s816_s21 = smov %s702_s24  ;;  %17 = sbr.rel (!%p15_p3) target bundleno = 3 (0x3), region = 75 }
 0x2e9   :  { %451 = vsyncpa [#allocation3], 1 }
 0x2ea   :  { %453 = vsyncpa [#allocation3 + $0x1], 1 }

</bundles_post_ra>
